<compile_context>
chip_gen: v7x
topology: tpu7x:2x2x1
jax: 0.10.0
libtpu: 0.0.40
codegen_flags: <defaults>
</compile_context>

<pallas_src>
import functools

import jax
import jax.numpy as jnp
from jax.experimental import pallas as pl
from jax.experimental.pallas import tpu as pltpu


_VMEM_BUDGET = 28 << 20        # budget for the batch-blocked (per-step) working set
_VMEM_FLOOR = 32 << 20
_VMEM_CAP = 64 << 20           # v7x per-TensorCore VMEM


def _pick_bt(B, bytes_per_batch, budget):
    """Batch rows per grid step.

    Keeps the double-buffered working set under `budget`, keeps the block
    (8, .)-tile friendly (Bt == B or Bt % 8 == 0), and keeps >= 2 grid steps
    when B allows so both v7x TensorCores get work on the "parallel" axis.
    """
    if B <= 8:
        return B
    fit = max(1, budget // max(1, bytes_per_batch))
    bt = max(8, (min(fit, B) // 8) * 8)
    if bt >= B:                      # leave >= 2 steps for megacore sharding
        bt = max(8, ((B // 2) // 8) * 8)
    return min(bt, B)


# ----------------------------- kernels ------------------------------------ #

def _score_softmax_kernel(q_ref, e_ref, o_ref):
    """scores[s, b] = sum_h e[s, b, h] * q[b, h];  softmax over s.

    q is `hidden` for method='dot' and `hidden @ W` for method='general'.
    Shapes: q_ref (Bt, H), e_ref (S, Bt, H) native seq-major, o_ref (S, Bt, 1).
    """
    q = q_ref[...].astype(jnp.float32)
    e = e_ref[...].astype(jnp.float32)
    scores = jnp.sum(e * q[None, :, :], axis=-1, keepdims=True)     # (S, Bt, 1)
    m = jnp.max(scores, axis=0, keepdims=True)                      # (1, Bt, 1)
    p = jnp.exp(scores - m)
    denom = jnp.sum(p, axis=0, keepdims=True)                       # (1, Bt, 1)
    o_ref[...] = (p * pl.reciprocal(denom, approx=False)).astype(o_ref.dtype)


def _concat_kernel(compute_dtype, ph_ref, e_ref, wet_ref, v_ref, o_ref):
    """energy = tanh(e @ W_e^T + (hidden @ W_h^T + b));  score = v . energy.

    ph_ref  (Bt, 1, H) : S-invariant hidden part (precomputed once per call).
    e_ref   (Bt, S, H) : encoder outputs, batch-major.
    wet_ref (H, H)     : W_e^T, VMEM-resident across grid steps.
    v_ref   (1, H)
    o_ref   (Bt, 1, S) : softmax over S.
    """
    Bt, S, H = e_ref.shape
    # tile-aligned collapse (S % 8 == 0 or Bt == 1, enforced by the wrapper)
    e2 = e_ref[...].reshape(Bt * S, H)
    part_e = jnp.dot(e2.astype(compute_dtype), wet_ref[...],
                     preferred_element_type=jnp.float32)            # (Bt*S, H) MXU
    energy = jnp.tanh(part_e.reshape(Bt, S, H) + ph_ref[...])       # (Bt, S, H)
    v3 = jnp.broadcast_to(v_ref[...].reshape(1, 1, H), (Bt, 1, H))
    scores = jnp.einsum("bkh,bsh->bks",
                        v3.astype(compute_dtype),
                        energy.astype(compute_dtype),
                        preferred_element_type=jnp.float32)         # (Bt, 1, S) MXU
    m = jnp.max(scores, axis=-1, keepdims=True)
    p = jnp.exp(scores - m)
    denom = jnp.sum(p, axis=-1, keepdims=True)
    o_ref[...] = (p * pl.reciprocal(denom, approx=False)).astype(o_ref.dtype)


# ----------------------------- wrapper ------------------------------------- #

class LuongAttentionPallas:
    """Pallas-TPU forward of the PyTorch LuongAttention module."""

    def __init__(self, method, hidden_size, key, compute_dtype=jnp.float32):
        if method not in ("dot", "general", "concat"):
            raise ValueError(method, "is not an appropriate attention method.")
        self.method = method
        self.hidden_size = hidden_size
        self.compute_dtype = compute_dtype
        H = hidden_size
        k1, k2, k3 = jax.random.split(key, 3)
        if method == "general":
            bound = 1.0 / float(H) ** 0.5
            self.W = jax.random.uniform(k1, (H, H), jnp.float32, -bound, bound)
            self.b = jax.random.uniform(k2, (H,), jnp.float32, -bound, bound)
        elif method == "concat":
            bound = 1.0 / float(2 * H) ** 0.5
            self.W = jax.random.uniform(k1, (H, 2 * H), jnp.float32, -bound, bound)
            self.b = jax.random.uniform(k2, (H,), jnp.float32, -bound, bound)
            self.v = jax.random.normal(k3, (H,), jnp.float32)
            # split the Linear: first H input columns act on hidden, last H on encoder
            self.W_hT = jnp.asarray(self.W[:, :H].T)                         # (H, H)
            self.W_eT = jnp.asarray(self.W[:, H:].T).astype(compute_dtype)   # (H, H)
            self.v_row = self.v.reshape(1, H)

    # --------------------------------------------------------------------- #

    def __call__(self, hidden, encoder_outputs):
        # hidden: (1, B, H); encoder_outputs: (S, B, H)  (PyTorch seq-first)
        S, B, H = encoder_outputs.shape
        del S
        h2 = hidden.reshape(B, H)                      # free leading-1 squeeze
        if self.method in ("dot", "general"):
            if self.method == "general":
                # score = hidden.(W e + b) == (hidden @ W).e + hidden.b; the
                # hidden.b term is constant over S -> softmax-invariant -> dropped.
                q = h2 @ self.W                        # one tiny (B,H)x(H,H) matmul
            else:
                q = h2
            return self._score_softmax(q, encoder_outputs)
        return self._concat(h2, encoder_outputs)

    # --------------------------------------------------------------------- #

    def _score_softmax(self, q, e):
        S, B, H = e.shape
        esz = e.dtype.itemsize
        per_b = S * H * (2 * esz + 4) + 2 * H * q.dtype.itemsize + 2 * S * 4
        Bt = _pick_bt(B, per_b, _VMEM_BUDGET)
        need = Bt * per_b + (2 << 20)
        vmem = int(min(_VMEM_CAP, max(_VMEM_FLOOR, need)))

        probs = pl.pallas_call(
            _score_softmax_kernel,
            out_shape=jax.ShapeDtypeStruct((S, B, 1), jnp.float32),
            grid=(pl.cdiv(B, Bt),),
            in_specs=[pl.BlockSpec((Bt, H), lambda b: (b, 0)),
                      pl.BlockSpec((S, Bt, H), lambda b: (0, b, 0))],
            out_specs=pl.BlockSpec((S, Bt, 1), lambda b: (0, b, 0)),
            compiler_params=pltpu.CompilerParams(
                dimension_semantics=("parallel",),
                vmem_limit_bytes=vmem),
        )(q, e)
        # Only the tiny (S, B) probability matrix is transposed in XLA; the big
        # (S, B, H) encoder tensor is never re-laid-out in HBM.
        return jnp.transpose(probs[:, :, 0])[:, None, :]

    # --------------------------------------------------------------------- #

    def _concat(self, h2, e):
        S, B, H = e.shape
        cd = self.compute_dtype
        csz = jnp.dtype(cd).itemsize
        # S-invariant hidden part of the Linear, computed once (1/S of the FLOPs).
        part_h = (h2 @ self.W_hT + self.b).reshape(B, 1, H)
        # batch-major so Bt*S contiguous rows feed one MXU matmul per grid step
        e_b = jnp.transpose(e, (1, 0, 2))                         # (B, S, H)
        esz = e_b.dtype.itemsize

        per_b = (S * H * (2 * esz + 8 + (csz if cd != jnp.float32 else 0))
                 + 2 * H * 4 + 2 * S * 4)
        fixed = 2 * H * H * csz + 2 * H * 4
        Bt = _pick_bt(B, per_b, max(_VMEM_BUDGET - fixed, 4 << 20))
        if S % 8 != 0 and Bt > 1:
            Bt = 1      # keep the (Bt,S,H)<->(Bt*S,H) collapse tile-aligned
        need = Bt * per_b + fixed + (2 << 20)
        vmem = int(min(_VMEM_CAP, max(_VMEM_FLOOR, need)))

        kern = functools.partial(_concat_kernel, cd)
        return pl.pallas_call(
            kern,
            out_shape=jax.ShapeDtypeStruct((B, 1, S), jnp.float32),
            grid=(pl.cdiv(B, Bt),),
            in_specs=[pl.BlockSpec((Bt, 1, H), lambda b: (b, 0, 0)),
                      pl.BlockSpec((Bt, S, H), lambda b: (b, 0, 0)),
                      pl.BlockSpec((H, H), lambda b: (0, 0)),      # resident weight
                      pl.BlockSpec((1, H), lambda b: (0, 0))],     # resident v
            out_specs=pl.BlockSpec((Bt, 1, S), lambda b: (b, 0, 0)),
            compiler_params=pltpu.CompilerParams(
                dimension_semantics=("parallel",),
                vmem_limit_bytes=vmem),
        )(part_h, e_b, self.W_eT, self.v_row)


# ----------------------------- reference ----------------------------------- #

def _reference(method, mod, hidden, encoder_outputs):
    """Pure-JAX mirror of the PyTorch module (original op order / layout)."""
    if method == "dot":
        scores = jnp.sum(hidden * encoder_outputs, axis=2)             # (S, B)
    elif method == "general":
        energy = jnp.einsum("sbh,kh->sbk", encoder_outputs, mod.W) + mod.b
        scores = jnp.sum(hidden * energy, axis=2)
    else:
        h_exp = jnp.broadcast_to(hidden, encoder_outputs.shape)
        cat = jnp.concatenate([h_exp, encoder_outputs], axis=2)
        energy = jnp.tanh(jnp.einsum("sbc,kc->sbk", cat, mod.W) + mod.b)
        scores = jnp.sum(mod.v * energy, axis=2)
    return jax.nn.softmax(scores.T, axis=1)[:, None, :]


# ----------------------------- main ---------------------------------------- #

if __name__ == "__main__":
    key = jax.random.PRNGKey(0)
    k_h, k_e, k_p = jax.random.split(key, 3)

    B, S, H = 2, 8, 32
    hidden = jax.random.normal(k_h, (1, B, H), jnp.float32)
    encoder_outputs = jax.random.normal(k_e, (S, B, H), jnp.float32)

    ok = True
    for method in ("dot", "general", "concat"):
        mod = LuongAttentionPallas(method, H, k_p)
        out = jax.block_until_ready(mod(hidden, encoder_outputs))
        ref = _reference(method, mod, hidden, encoder_outputs)
        assert out.shape == (B, 1, S), (method, out.shape)
        if not jnp.allclose(out, ref, atol=1e-5, rtol=1e-4):
            ok = False
            err = float(jnp.max(jnp.abs(out - ref)))
            print(f"MISMATCH in method={method} (max abs err {err:.3e})")

    if ok:
        print("KERNEL_OK")
</pallas_src>

<mosaic_0001>
module attributes {stable_mosaic.version = 11 : i64} {
  func.func @_score_softmax_kernel(%arg0: i32, %arg1: memref<2x32xf32, #tpu.memory_space<vmem>>, %arg2: memref<8x2x32xf32, #tpu.memory_space<vmem>>, %arg3: memref<8x2x1xf32, #tpu.memory_space<vmem>>) attributes {dimension_semantics = [#tpu.dimension_semantics<parallel>], iteration_bounds = array<i64: 1>, scalar_prefetch = 0 : i64, scratch_operands = 0 : i64, tpu.core_type = #tpu.core_type<tc>, window_params = [{transform_indices = @transform_0, window_bounds = array<i64: 2, 32>}, {transform_indices = @transform_1, window_bounds = array<i64: 8, 2, 32>}, {transform_indices = @transform_2, window_bounds = array<i64: 8, 2, 1>}]} {
    %c0 = arith.constant 0 : index
    %c0_0 = arith.constant 0 : index
    %0 = vector.load %arg1[%c0, %c0_0] : memref<2x32xf32, #tpu.memory_space<vmem>>, vector<2x32xf32>
    %c0_1 = arith.constant 0 : index
    %c0_2 = arith.constant 0 : index
    %c0_3 = arith.constant 0 : index
    %1 = vector.load %arg2[%c0_1, %c0_2, %c0_3] : memref<8x2x32xf32, #tpu.memory_space<vmem>>, vector<8x2x32xf32>
    %2 = vector.shape_cast %0 : vector<2x32xf32> to vector<1x2x32xf32>
    %3 = vector.broadcast %2 : vector<1x2x32xf32> to vector<8x2x32xf32>
    %4 = arith.mulf %1, %3 : vector<8x2x32xf32>
    %cst = arith.constant dense<0.000000e+00> : vector<8x2xf32>
    %5 = vector.multi_reduction <add>, %4, %cst [2] : vector<8x2x32xf32> to vector<8x2xf32>
    %6 = vector.shape_cast %5 : vector<8x2xf32> to vector<8x2x1xf32>
    %cst_4 = arith.constant dense<0xFF800000> : vector<2x1xf32>
    %7 = vector.multi_reduction <maximumf>, %6, %cst_4 [0] : vector<8x2x1xf32> to vector<2x1xf32>
    %8 = vector.shape_cast %7 : vector<2x1xf32> to vector<1x2x1xf32>
    %9 = vector.broadcast %8 : vector<1x2x1xf32> to vector<8x2x1xf32>
    %10 = arith.subf %6, %9 : vector<8x2x1xf32>
    %11 = math.exp %10 : vector<8x2x1xf32>
    %cst_5 = arith.constant dense<0.000000e+00> : vector<2x1xf32>
    %12 = vector.multi_reduction <add>, %11, %cst_5 [0] : vector<8x2x1xf32> to vector<2x1xf32>
    %13 = vector.shape_cast %12 : vector<2x1xf32> to vector<1x2x1xf32>
    %14 = tpu.reciprocal %13 : vector<1x2x1xf32> -> vector<1x2x1xf32>
    %15 = vector.broadcast %14 : vector<1x2x1xf32> to vector<8x2x1xf32>
    %16 = arith.mulf %11, %15 : vector<8x2x1xf32>
    %c0_6 = arith.constant 0 : index
    %c0_7 = arith.constant 0 : index
    %c0_8 = arith.constant 0 : index
    %17 = vector.load %arg3[%c0_6, %c0_7, %c0_8] : memref<8x2x1xf32, #tpu.memory_space<vmem>>, vector<8x2x1xf32>
    tpu.vector_store %arg3[%c0_6, %c0_7, %c0_8], %16 {strides = array<i32>} : memref<8x2x1xf32, #tpu.memory_space<vmem>>, vector<8x2x1xf32>,
    return
  }
  func.func @transform_0(%arg0: i32) -> (i32, i32) {
    %c0_i32 = arith.constant 0 : i32
    %c0_i32_0 = arith.constant 0 : i32
    return %arg0, %c0_i32 : i32, i32
  }
  func.func @transform_1(%arg0: i32) -> (i32, i32, i32) {
    %c0_i32 = arith.constant 0 : i32
    %c0_i32_0 = arith.constant 0 : i32
    %c0_i32_1 = arith.constant 0 : i32
    return %c0_i32, %arg0, %c0_i32_0 : i32, i32, i32
  }
  func.func @transform_2(%arg0: i32) -> (i32, i32, i32) {
    %c0_i32 = arith.constant 0 : i32
    %c0_i32_0 = arith.constant 0 : i32
    %c0_i32_1 = arith.constant 0 : i32
    return %c0_i32, %arg0, %c0_i32_0 : i32, i32, i32
  }
}

</mosaic_0001>

<bundles_post_ra>
// kernel: tpu_custom_call.1
= control target key start
LH: loop header
LB: loop body
LE: loop exit
PB: predicated region body
PF: predicated region fallthrough
CT: control target
= control target key end

     0   :  { %7 = vsyncpa [#allocation3], 0  ;;  %s334_s0 = inlined_call_operand.hbm [shape: f32[2,32], index: 0, kind: input, shape index: {}]   ;;  %s335_s1 = inlined_call_operand.hbm [shape: f32[8,2,32], index: 1, kind: input, shape index: {}]   ;;  %s336_s2 = inlined_call_operand.vmem [shape: f32[8,2,1], index: 2, kind: output, shape index: {}]  }
   0x1   :  { %8 = vsyncpa [#allocation5], 0  ;;  %s228_s9 = smov [#allocation2]   ;;  %s229_s11 = smov [#allocation4]  }
   0x2   :  { %s15_s10 = sshll.u32 %s228_s9, 4  ;;  %s24_s12 = sshll.u32 %s229_s11, 4  ;;  %s16_s10 = int_to_ptr.vmem [resolvable:$true] %s15_s10  ;;  %s247_s12 = int_to_ptr.vmem [resolvable:$true] %s24_s12 }
   0x3   :  { %s180_s15 = scalar_lea.hbm %s334_s0, 32 }
   0x4   :  { %p181_p0 = scmp.ne.s32.totalorder %s334_s0, %s180_s15  ;;  %p184_p1 = scmp.lt.u32.totalorder %s180_s15, %s334_s0 }
   0x6   :  { %p186_p2 = pnand %p184_p1, %p181_p0 }
   0x8   :  { %189 = shalt.err (!%p186_p2)
}
   0x9   :  { %s190_s20 = scalar_lea.vmem %s16_s10, 32  ;;  %p195_p4 = scmp.lt.s32.totalorder %s16_s10, %s16_s10 }
   0xa   :  { %p191_p3 = scmp.ne.s32.totalorder %s16_s10, %s190_s20  ;;  %p196_p5 = scmp.lt.s32.totalorder %s190_s20, %s190_s20 }
   0xc   :  { %p197_p6 = por %p196_p5, %p195_p4 }
   0xe   :  { %p198_p7 = pnand %p197_p6, %p191_p3 }
  0x10   :  { %201 = shalt.err (!%p198_p7)
}
  0x11   :  { %18 = dma.hbm_to_vmem [thread:$0]  %s334_s0, 32, %s16_s10, [#allocation3]  }
  0x12   :  { %s202_s25 = scalar_lea.hbm %s335_s1, 256 }
  0x13   :  { %p203_p8 = scmp.ne.s32.totalorder %s335_s1, %s202_s25  ;;  %p206_p9 = scmp.lt.u32.totalorder %s202_s25, %s335_s1 }
  0x15   :  { %p208_p10 = pnand %p206_p9, %p203_p8 }
  0x17   :  { %211 = shalt.err (!%p208_p10)
}
  0x18   :  { %s212_s30 = scalar_lea.vmem %s247_s12, 256  ;;  %p217_p12 = scmp.lt.s32.totalorder %s247_s12, %s247_s12 }
  0x19   :  { %p213_p11 = scmp.ne.s32.totalorder %s247_s12, %s212_s30  ;;  %p218_p13 = scmp.lt.s32.totalorder %s212_s30, %s212_s30 }
  0x1b   :  { %p219_p0 = por %p218_p13, %p217_p12 }
  0x1d   :  { %p220_p1 = pnand %p219_p0, %p213_p11 }
  0x1f   :  { %223 = shalt.err (!%p220_p1)
}
  0x20   :  { %s230_s0 = smov 32   ;;  %s231_s3 = smov 2  }
  0x21   :  { %30 = dma.hbm_to_vmem [thread:$0]  %s335_s1, 256, %s247_s12, [#allocation5], %s230_s0, %s230_s0, %s231_s3  }
  0x22   :  { %224 = dma.done.wait [#allocation3], 32  }
  0x23   :  { %225 = vsyncadd [#allocation3], 4294967264 }
  0x24   :  { %226 = dma.done.wait [#allocation5], 256  }
  0x25   :  { %227 = vsyncadd [#allocation5], 4294967040  ;;  %vm54_vm0 = vcmask 254976   ;;  %v37_v0 = vld [vmem:[#allocation2] sm:$0x3]  ;;  %vm79_vm1 = vcmask 1041408  }
  0x26   :  { %v40_v1 = vld [vmem:[#allocation4 + $0x4] sm:$0x3]  ;;  %v38_v2 = vld [vmem:[#allocation4] sm:$0x3]  ;;  %v41_v5 = vld [vmem:[#allocation4 + $0x6] sm:$0x3] }
  0x27   :  { %v48_v3 = vmul.f32 %v40_v1, %v37_v0  ;;  %v46_v4 = vmul.f32 %v38_v2, %v37_v0  ;;  %v39_v6 = vld [vmem:[#allocation4 + $0x2] sm:$0x3]  ;;  %v49_v7 = vmul.f32 %v41_v5, %v37_v0  ;;  %v43_v9 = vld [vmem:[#allocation4 + $0xa] sm:$0x3]  ;;  %v42_v10 = vld [vmem:[#allocation4 + $0x8] sm:$0x3] }
  0x28   :  { %v47_v8 = vmul.f32 %v39_v6, %v37_v0  ;;  %v51_v15 = vmul.f32 %v43_v9, %v37_v0  ;;  %v50_v16 = vmul.f32 %v42_v10, %v37_v0  ;;  %v45_v17 = vld [vmem:[#allocation4 + $0xe] sm:$0x3]  ;;  %v44_v18 = vld [vmem:[#allocation4 + $0xc] sm:$0x3]  ;;  %vm143_vm2 = vcmask 1024  }
  0x29   :  { %v61_v11 = vsel %vm54_vm0, %v48_v3, 0.0  ;;  %v55_v12 = vsel %vm54_vm0, %v46_v4, 0.0  ;;  %v64_v13 = vsel %vm54_vm0, %v49_v7, 0.0  ;;  %v53_v21 = vmul.f32 %v45_v17, %v37_v0 }
  0x2a   :  { %62 = vadd.xlane.f32.xlu1 %v61_v11  ;;  %56 = vadd.xlane.f32.xlu0 %v55_v12  ;;  %v58_v14 = vsel %vm54_vm0, %v47_v8, 0.0  ;;  %v70_v19 = vsel %vm54_vm0, %v51_v15, 0.0  ;;  %v67_v20 = vsel %vm54_vm0, %v50_v16, 0.0  ;;  %v52_v22 = vmul.f32 %v44_v18, %v37_v0 }
  0x2b   :  { %v76_v23 = vsel %vm54_vm0, %v53_v21, 0.0 }
  0x2c   :  { %v73_v24 = vsel %vm54_vm0, %v52_v22, 0.0 }
  0x2e   :  { %65 = vadd.xlane.f32.xlu1 %v64_v13  ;;  %59 = vadd.xlane.f32.xlu0 %v58_v14 }
  0x32   :  { %71 = vadd.xlane.f32.xlu1 %v70_v19  ;;  %68 = vadd.xlane.f32.xlu0 %v67_v20 }
  0x36   :  { %77 = vadd.xlane.f32.xlu1 %v76_v23  ;;  %74 = vadd.xlane.f32.xlu0 %v73_v24 }
  0xb7   :  { %v63_v25 = vpop.xlane.xlu1 %62  ;;  %v57_v26 = vpop.xlane.xlu0 %56 }
  0xb8   :  { %v80_v33 = vsel %vm79_vm1, %v57_v26, -inf  ;;  %v82_v39 = vsel %vm79_vm1, %v63_v25, -inf }
  0xbb   :  { %v66_v27 = vpop.xlane.xlu1 %65  ;;  %v60_v28 = vpop.xlane.xlu0 %59 }
  0xbc   :  { %v81_v34 = vsel %vm79_vm1, %v60_v28, -inf  ;;  %v83_v40 = vsel %vm79_vm1, %v66_v27, -inf }
  0xbf   :  { %v72_v29 = vpop.xlane.xlu1 %71  ;;  %v69_v30 = vpop.xlane.xlu0 %68 }
  0xc0   :  { %v86_v31 = vsel %vm79_vm1, %v72_v29, -inf  ;;  %v84_v32 = vsel %vm79_vm1, %v69_v30, -inf }
  0xc1   :  { %v87_v35 = vmax.f32 %v81_v34, %v86_v31  ;;  %v85_v36 = vmax.f32 %v80_v33, %v84_v32 }
  0xc3   :  { %v78_v37 = vpop.xlane.xlu1 %77  ;;  %v75_v38 = vpop.xlane.xlu0 %74  ;;  %v92_v45 = vmax.f32 %v85_v36, %v87_v35 }
  0xc4   :  { %v90_v41 = vsel %vm79_vm1, %v78_v37, -inf  ;;  %v88_v42 = vsel %vm79_vm1, %v75_v38, -inf }
  0xc5   :  { %v91_v43 = vmax.f32 %v83_v40, %v90_v41  ;;  %v89_v44 = vmax.f32 %v82_v39, %v88_v42 }
  0xc7   :  { %v93_v46 = vmax.f32 %v89_v44, %v91_v43 }
  0xc9   :  { %v94_v47 = vmax.f32 %v92_v45, %v93_v46 }
  0xcb   :  { %v95_v48 = vsub.f32 %v57_v26, %v94_v47  ;;  %v96_v49 = vsub.f32 %v60_v28, %v94_v47  ;;  %v97_v50 = vsub.f32 %v63_v25, %v94_v47  ;;  %v98_v51 = vsub.f32 %v66_v27, %v94_v47 }
  0xcc   :  { %v99_v52 = vsub.f32 %v69_v30, %v94_v47  ;;  %v100_v56 = vsub.f32 %v72_v29, %v94_v47  ;;  %v101_v58 = vsub.f32 %v75_v38, %v94_v47  ;;  %v102_v60 = vsub.f32 %v78_v37, %v94_v47 }
  0xcd   :  { %v103_v53 = vmul.f32 1.442695, %v95_v48  ;;  %v105_v54 = vmul.f32 1.442695, %v96_v49  ;;  %v107_v55 = vmul.f32 1.442695, %v97_v50 }
  0xce   :  { %v109_v57 = vmul.f32 1.442695, %v98_v51  ;;  %v111_v59 = vmul.f32 1.442695, %v99_v52  ;;  %v113_v61 = vmul.f32 1.442695, %v100_v56 }
  0xcf   :  { %162 = vpow2.f32 %v103_v53  ;;  %v115_v62 = vmul.f32 1.442695, %v101_v58  ;;  %v117_v63 = vmul.f32 1.442695, %v102_v60 }
  0xd0   :  { %164 = vpow2.f32 %v105_v54 }
  0xd1   :  { %166 = vpow2.f32 %v107_v55 }
  0xd2   :  { %168 = vpow2.f32 %v109_v57 }
  0xd3   :  { %170 = vpow2.f32 %v111_v59 }
  0xd4   :  { %172 = vpow2.f32 %v113_v61 }
  0xd5   :  { %174 = vpow2.f32 %v115_v62 }
  0xd6   :  { %176 = vpow2.f32 %v117_v63 }
  0xd9   :  { %v163_v0 = vpop.eup %162 }
  0xda   :  { %v165_v1 = vpop.eup %164  ;;  %v119_v2 = vsel %vm79_vm1, %v163_v0, 0.0 }
  0xdb   :  { %v167_v3 = vpop.eup %166  ;;  %v120_v4 = vsel %vm79_vm1, %v165_v1, 0.0 }
  0xdc   :  { %v169_v5 = vpop.eup %168  ;;  %v121_v6 = vadd.f32 %v120_v4, %v119_v2  ;;  %v122_v7 = vsel %vm79_vm1, %v167_v3, 0.0 }
  0xdd   :  { %v171_v8 = vpop.eup %170  ;;  %v124_v10 = vsel %vm79_vm1, %v169_v5, 0.0 }
  0xde   :  { %v123_v9 = vadd.f32 %v122_v7, %v121_v6  ;;  %v173_v11 = vpop.eup %172  ;;  %v126_v13 = vsel %vm79_vm1, %v171_v8, 0.0 }
  0xdf   :  { %v175_v14 = vpop.eup %174  ;;  %v128_v16 = vsel %vm79_vm1, %v173_v11, 0.0 }
  0xe0   :  { %v125_v12 = vadd.f32 %v124_v10, %v123_v9  ;;  %v177_v17 = vpop.eup %176  ;;  %v130_v19 = vsel %vm79_vm1, %v175_v14, 0.0 }
  0xe1   :  { %v132_v21 = vsel %vm79_vm1, %v177_v17, 0.0 }
  0xe2   :  { %v127_v15 = vadd.f32 %v126_v13, %v125_v12 }
  0xe4   :  { %v129_v18 = vadd.f32 %v128_v16, %v127_v15 }
  0xe6   :  { %v131_v20 = vadd.f32 %v130_v19, %v129_v18 }
  0xe8   :  { %v133_v22 = vadd.f32 %v132_v21, %v131_v20 }
  0xea   :  { %178 = vrcp.f32 %v133_v22 }
  0xf4   :  { %v179_v23 = vpop.eup %178 }
  0xf5   :  { %v135_v24 = vmul.f32 %v179_v23, %v163_v0  ;;  %v136_v25 = vmul.f32 %v179_v23, %v165_v1  ;;  %v137_v26 = vmul.f32 %v179_v23, %v167_v3  ;;  %v138_v27 = vmul.f32 %v179_v23, %v169_v5 }
  0xf6   :  { %v139_v28 = vmul.f32 %v179_v23, %v171_v8  ;;  %v140_v29 = vmul.f32 %v179_v23, %v173_v11  ;;  %v141_v30 = vmul.f32 %v179_v23, %v175_v14  ;;  %v142_v31 = vmul.f32 %v179_v23, %v177_v17 }
  0xf7   :  { %144 = vst.msk [vmem:[%s336_s2] sm:$0x3] %vm143_vm2, %v135_v24  ;;  %145 = vst.msk [vmem:[%s336_s2 + $0x2] sm:$0x3] %vm143_vm2, %v136_v25 }
  0xf8   :  { %146 = vst.msk [vmem:[%s336_s2 + $0x4] sm:$0x3] %vm143_vm2, %v137_v26  ;;  %147 = vst.msk [vmem:[%s336_s2 + $0x6] sm:$0x3] %vm143_vm2, %v138_v27 }
  0xf9   :  { %148 = vst.msk [vmem:[%s336_s2 + $0x8] sm:$0x3] %vm143_vm2, %v139_v28  ;;  %149 = vst.msk [vmem:[%s336_s2 + $0xa] sm:$0x3] %vm143_vm2, %v140_v29 }
  0xfa   :  { %150 = vst.msk [vmem:[%s336_s2 + $0xc] sm:$0x3] %vm143_vm2, %v141_v30  ;;  %151 = vst.msk [vmem:[%s336_s2 + $0xe] sm:$0x3] %vm143_vm2, %v142_v31 }
  0xfb   :  { %156 = vsyncpa [#allocation3], 1 }
  0xfc   :  { %157 = vsyncpa [#allocation5], 1 }

</bundles_post_ra>
